<compile_context>
chip_gen: v6e
topology: v6e:2x2x1
jax: 0.10.0
libtpu: 0.0.40
codegen_flags: <defaults>
</compile_context>

<pallas_src>
import functools

import jax
import jax.numpy as jnp
import numpy as np
from jax.experimental import pallas as pl
from jax.experimental.pallas import tpu as pltpu


def _round_up(x, m):
    return ((x + m - 1) // m) * m


def coattention_kernel(x_ref, w_ref, wh_ref, bh_ref, out_ref, *, nv, nq):
    """Single-invocation CoAttention forward.

    x_ref  : [B, Nv+Nq, Hp] f32   rows 0:Nv = v, rows Nv: = q; lane H holds the
                                  bias "ones" column, lanes H+1.. are zero.
    w_ref  : [Hp, Hp+2*Kp] bf16   [:, :Hp] = linear_aff, [:, Hp:Hp+Kp] = linear_v,
                                  [:, Hp+Kp:] = linear_q; biases folded into row H.
    wh_ref : [2, Kp] f32          row 0 = linear_hv weight, row 1 = linear_hq.
    bh_ref : (2,) f32 in SMEM     [b_hv, b_hq].
    out_ref: [B, 2, Hp] f32       row 0 = v_hat, row 1 = q_hat (padding stripped
                                  in the wrapper).
    """
    x = x_ref[...]
    B, n_all, hp = x.shape
    kp = (w_ref.shape[1] - hp) // 2

    x_bf = x.astype(jnp.bfloat16)

    # ---- All three linear layers in ONE MXU push against the packed bf16 RHS.
    y = jnp.dot(x_bf.reshape(B * n_all, hp), w_ref[...],
                preferred_element_type=jnp.float32).reshape(B, n_all, hp + 2 * kp)

    aff_v = y[:, :nv, :hp]            # linear_aff(v)   [B, Nv, Hp]
    lv    = y[:, :nv, hp:hp + kp]     # linear_v(v)     [B, Nv, Kp]
    lq    = y[:, nv:, hp + kp:]       # linear_q(q)     [B, Nq, Kp]
    q_bf  = x_bf[:, nv:, :]           # padded q        [B, Nq, Hp]

    # ---- Affinity tanh(q @ linear_aff(v)^T), computed ONCE.  The transposed
    # orientation is consumed below purely via contraction dimension numbers
    # (no materialized swapaxes / second matmul+tanh).
    aff = jnp.tanh(jnp.einsum('bqh,bnh->bqn', q_bf, aff_v.astype(jnp.bfloat16),
                              preferred_element_type=jnp.float32))      # [B, Nq, Nv]

    aff_bf = aff.astype(jnp.bfloat16)
    # wqc[b,n,k] = sum_q linear_q(q)[b,q,k] * aff[b,q,n]
    wqc = jnp.einsum('bqn,bqk->bnk', aff_bf, lq.astype(jnp.bfloat16),
                     preferred_element_type=jnp.float32)
    # wvc[b,q,k] = sum_n linear_v(v)[b,n,k] * aff[b,q,n]
    wvc = jnp.einsum('bqn,bnk->bqk', aff_bf, lv.astype(jnp.bfloat16),
                     preferred_element_type=jnp.float32)
    h_v = jnp.tanh(lv + wqc)          # [B, Nv, Kp] f32
    h_q = jnp.tanh(lq + wvc)          # [B, Nq, Kp] f32

    # ---- Attention logits: Linear(K -> 1) as broadcast-multiply + lane reduce.
    w_h = wh_ref[...]
    logit_v = jnp.sum(h_v * w_h[0:1, :].reshape(1, 1, kp),
                      axis=-1, keepdims=True) + bh_ref[0]               # [B, Nv, 1]
    logit_q = jnp.sum(h_q * w_h[1:2, :].reshape(1, 1, kp),
                      axis=-1, keepdims=True) + bh_ref[1]               # [B, Nq, 1]

    # ---- nn.Softmax() with no dim on a 3-D input => dim=0 (batch) in PyTorch.
    def softmax_dim0(z):
        m = jnp.max(z, axis=0, keepdims=True)
        e = jnp.exp(z - m)
        return e / jnp.sum(e, axis=0, keepdims=True)

    a_v = softmax_dim0(logit_v)                                         # [B, Nv, 1]
    a_q = softmax_dim0(logit_q)                                         # [B, Nq, 1]

    # ---- Pooled outputs (full-precision activations); single lane-dense output.
    out_ref[:, 0:1, :] = jnp.sum(a_v * x[:, :nv, :], axis=1, keepdims=True)
    out_ref[:, 1:2, :] = jnp.sum(a_q * x[:, nv:, :], axis=1, keepdims=True)


def prepare_params(params, hidden_size, hidden_size_attn):
    """One-time packing/padding of the CoAttention weights (param-load time)."""
    H, K = hidden_size, hidden_size_attn
    f32 = jnp.float32
    Hp = _round_up(H + 1, 128)   # +1: "ones" column that carries the folded biases
    Kp = _round_up(K, 128)

    w_aff_p = (jnp.zeros((Hp, Hp), f32)
               .at[:H, :H].set(params['w_aff'])
               .at[H, :H].set(params['b_aff'].reshape(H)))
    # GUARD: columns H..Hp of the w_aff block MUST remain zero — the inputs
    # carry a 1.0 in lane H, so any nonzero entry here would corrupt the
    # affinity matmul.
    w_v_p = (jnp.zeros((Hp, Kp), f32)
             .at[:H, :K].set(params['w_v'])
             .at[H, :K].set(params['b_v'].reshape(K)))
    w_q_p = (jnp.zeros((Hp, Kp), f32)
             .at[:H, :K].set(params['w_q'])
             .at[H, :K].set(params['b_q'].reshape(K)))
    # Packed RHS: one MXU matmul computes all three linears (256-wide fill on
    # v6e/v7x for the v-side slice; exact because padded rows/cols are zero).
    w_all = jnp.concatenate([w_aff_p, w_v_p, w_q_p], axis=1).astype(jnp.bfloat16)

    w_h = (jnp.zeros((2, Kp), f32)
           .at[0, :K].set(params['w_hv'].reshape(K))
           .at[1, :K].set(params['w_hq'].reshape(K)))
    b_h = jnp.concatenate([params['b_hv'].reshape(1),
                           params['b_hq'].reshape(1)]).astype(f32)

    return dict(w_all=w_all, w_h=w_h, b_h=b_h)


def coattention(v, q, prep):
    B, Nv, H = v.shape
    _, Nq, _ = q.shape
    N = Nv + Nq
    Hp = prep['w_all'].shape[0]
    Kp = prep['w_h'].shape[1]
    f32 = jnp.float32

    # Fused activation packing: [v | q] along rows, [data | 1 | 0...] along lanes.
    x = jnp.concatenate([v.astype(f32), q.astype(f32)], axis=1)          # [B, N, H]
    pad = jnp.concatenate([jnp.ones((B, N, 1), f32),
                           jnp.zeros((B, N, Hp - H - 1), f32)], axis=-1)
    x_pad = jnp.concatenate([x, pad], axis=-1)                           # [B, N, Hp]

    cost = pl.CostEstimate(
        flops=int(2 * B * N * Hp * (Hp + 2 * Kp)      # packed linear matmul
                  + 2 * B * Nq * Nv * Hp              # affinity
                  + 4 * B * Nq * Nv * Kp              # wqc + wvc
                  + 2 * B * N * Kp),                  # attention logits
        transcendentals=int(B * Nq * Nv + B * N * Kp + 2 * B * N),
        bytes_accessed=int(B * N * Hp * 4             # x_pad (f32)
                           + Hp * (Hp + 2 * Kp) * 2   # packed weights (bf16)
                           + 2 * Kp * 4 + 2 * 4       # head weights + scalars
                           + B * 2 * Hp * 4))         # packed output

    vmem = pl.BlockSpec(memory_space=pltpu.MemorySpace.VMEM)
    smem = pl.BlockSpec(memory_space=pltpu.MemorySpace.SMEM)

    out = pl.pallas_call(
        functools.partial(coattention_kernel, nv=Nv, nq=Nq),
        out_shape=jax.ShapeDtypeStruct((B, 2, Hp), f32),
        in_specs=[vmem, vmem, vmem, smem],
        out_specs=vmem,
        cost_estimate=cost,
    )(x_pad, prep['w_all'], prep['w_h'], prep['b_h'])

    # Strip padding (and the bias ones-column) in the wrapper.
    return (out[:, 0:1, :H].astype(v.dtype),
            out[:, 1:2, :H].astype(q.dtype))


def init_params(key, hidden_size, hidden_size_attn):
    # Deterministic synthetic init mirroring init_weights(): W ~ N(0, 0.02), b = 0.
    ks = jax.random.split(key, 5)
    std = 0.02
    return dict(
        w_aff=std * jax.random.normal(ks[0], (hidden_size, hidden_size), jnp.float32),
        b_aff=jnp.zeros((1, hidden_size), jnp.float32),
        w_v=std * jax.random.normal(ks[1], (hidden_size, hidden_size_attn), jnp.float32),
        b_v=jnp.zeros((1, hidden_size_attn), jnp.float32),
        w_q=std * jax.random.normal(ks[2], (hidden_size, hidden_size_attn), jnp.float32),
        b_q=jnp.zeros((1, hidden_size_attn), jnp.float32),
        w_hv=std * jax.random.normal(ks[3], (1, hidden_size_attn), jnp.float32),
        b_hv=jnp.zeros((1, 1), jnp.float32),
        w_hq=std * jax.random.normal(ks[4], (1, hidden_size_attn), jnp.float32),
        b_hq=jnp.zeros((1, 1), jnp.float32),
    )


def coattention_ref(v, q, p):
    # Pure-JAX reference mirroring the PyTorch forward (including dim=0 softmax quirk).
    lin = lambda x, w, b: jnp.einsum('bnh,hk->bnk', x, w) + b.reshape(1, 1, -1)
    aff_v = lin(v, p['w_aff'], p['b_aff'])
    affinity = jnp.tanh(jnp.einsum('bqh,bnh->bqn', q, aff_v))
    lv = lin(v, p['w_v'], p['b_v'])
    lq = lin(q, p['w_q'], p['b_q'])
    h_v = jnp.tanh(lv + jnp.einsum('bqk,bqn->bnk', lq, affinity))
    h_q = jnp.tanh(lq + jnp.einsum('bnk,bqn->bqk', lv, affinity))
    logit_v = jnp.einsum('bnk,ok->bno', h_v, p['w_hv']) + p['b_hv'][0, 0]
    logit_q = jnp.einsum('bqk,ok->bqo', h_q, p['w_hq']) + p['b_hq'][0, 0]
    a_v = jax.nn.softmax(logit_v, axis=0)
    a_q = jax.nn.softmax(logit_q, axis=0)
    v_hat = jnp.einsum('bno,bnh->boh', a_v, v)
    q_hat = jnp.einsum('bqo,bqh->boh', a_q, q)
    return v_hat, q_hat


if __name__ == "__main__":
    B, Nv, Nq = 2, 16, 8          # e.g. 4x4 "image" positions, 8 question tokens
    hidden_size, hidden_size_attn = 32, 16

    key = jax.random.PRNGKey(0)
    kv, kq, kp = jax.random.split(key, 3)
    v = jax.random.normal(kv, (B, Nv, hidden_size), jnp.float32)
    q = jax.random.normal(kq, (B, Nq, hidden_size), jnp.float32)
    params = init_params(kp, hidden_size, hidden_size_attn)

    # Weight packing happens ONCE here, not per call.
    prep = prepare_params(params, hidden_size, hidden_size_attn)

    coattn = jax.jit(coattention)
    v_hat, q_hat = coattn(v, q, prep)
    jax.block_until_ready((v_hat, q_hat))

    v_ref, q_ref = coattention_ref(v, q, params)
    assert v_hat.shape == (B, 1, hidden_size) and q_hat.shape == (B, 1, hidden_size)
    np.testing.assert_allclose(np.asarray(v_hat), np.asarray(v_ref), rtol=1e-2, atol=1e-2)
    np.testing.assert_allclose(np.asarray(q_hat), np.asarray(q_ref), rtol=1e-2, atol=1e-2)

    print("KERNEL_OK")
</pallas_src>

<mosaic_0001>
module attributes {stable_mosaic.version = 11 : i64} {
  func.func @coattention_kernel(%arg0: memref<2x24x128xf32, #tpu.memory_space<vmem>>, %arg1: memref<128x384xbf16, #tpu.memory_space<vmem>>, %arg2: memref<2x128xf32, #tpu.memory_space<vmem>>, %arg3: memref<2xf32, #tpu.memory_space<smem>>, %arg4: memref<2x2x128xf32, #tpu.memory_space<vmem>>) attributes {dimension_semantics = [], scalar_prefetch = 0 : i64, scratch_operands = 0 : i64, tpu.core_type = #tpu.core_type<tc>} {
    %c0 = arith.constant 0 : index
    %c0_0 = arith.constant 0 : index
    %c0_1 = arith.constant 0 : index
    %0 = vector.load %arg0[%c0, %c0_0, %c0_1] : memref<2x24x128xf32, #tpu.memory_space<vmem>>, vector<2x24x128xf32>
    %1 = arith.truncf %0 : vector<2x24x128xf32> to vector<2x24x128xbf16>
    %2 = vector.shape_cast %1 : vector<2x24x128xbf16> to vector<48x128xbf16>
    %c0_2 = arith.constant 0 : index
    %c0_3 = arith.constant 0 : index
    %3 = vector.load %arg1[%c0_2, %c0_3] : memref<128x384xbf16, #tpu.memory_space<vmem>>, vector<128x384xbf16>
    %cst = arith.constant dense<0.000000e+00> : vector<48x384xf32>
    %4 = tpu.matmul %2, %3, %cst {dimension_numbers = #tpu.dot_dimension_numbers<[1], [0], [0], [1], [0, 0, 1, 1], [], []>} : vector<48x128xbf16>, vector<128x384xbf16>, vector<48x384xf32> -> vector<48x384xf32>
    %5 = vector.shape_cast %4 : vector<48x384xf32> to vector<2x24x384xf32>
    %6 = vector.extract_strided_slice %5 {offsets = [0, 0, 0], sizes = [2, 16, 128], strides = [1, 1, 1]} : vector<2x24x384xf32> to vector<2x16x128xf32>
    %7 = vector.extract_strided_slice %5 {offsets = [0, 0, 128], sizes = [2, 16, 128], strides = [1, 1, 1]} : vector<2x24x384xf32> to vector<2x16x128xf32>
    %8 = vector.extract_strided_slice %5 {offsets = [0, 16, 256], sizes = [2, 8, 128], strides = [1, 1, 1]} : vector<2x24x384xf32> to vector<2x8x128xf32>
    %9 = vector.extract_strided_slice %1 {offsets = [0, 16, 0], sizes = [2, 8, 128], strides = [1, 1, 1]} : vector<2x24x128xbf16> to vector<2x8x128xbf16>
    %10 = arith.truncf %6 : vector<2x16x128xf32> to vector<2x16x128xbf16>
    "tpu.trace_start"() <{level = 10 : i32, message = "bqh,bnh->bqn"}> : () -> ()
    %cst_4 = arith.constant dense<0.000000e+00> : vector<2x8x16xf32>
    %11 = tpu.matmul %9, %10, %cst_4 {dimension_numbers = #tpu.dot_dimension_numbers<[2], [2], [1], [1], [0, 0, 0, 1, 1, 1], [0], [0]>} : vector<2x8x128xbf16>, vector<2x16x128xbf16>, vector<2x8x16xf32> -> vector<2x8x16xf32>
    "tpu.trace_stop"() : () -> ()
    %12 = math.tanh %11 : vector<2x8x16xf32>
    %13 = arith.truncf %12 : vector<2x8x16xf32> to vector<2x8x16xbf16>
    %14 = arith.truncf %8 : vector<2x8x128xf32> to vector<2x8x128xbf16>
    "tpu.trace_start"() <{level = 10 : i32, message = "bqn,bqk->bnk"}> : () -> ()
    %cst_5 = arith.constant dense<0.000000e+00> : vector<2x16x128xf32>
    %15 = tpu.matmul %13, %14, %cst_5 {dimension_numbers = #tpu.dot_dimension_numbers<[1], [1], [2], [2], [0, 0, 0, 2, 1, 2], [0], [0]>} : vector<2x8x16xbf16>, vector<2x8x128xbf16>, vector<2x16x128xf32> -> vector<2x16x128xf32>
    "tpu.trace_stop"() : () -> ()
    %16 = arith.truncf %7 : vector<2x16x128xf32> to vector<2x16x128xbf16>
    "tpu.trace_start"() <{level = 10 : i32, message = "bqn,bnk->bqk"}> : () -> ()
    %cst_6 = arith.constant dense<0.000000e+00> : vector<2x8x128xf32>
    %17 = tpu.matmul %13, %16, %cst_6 {dimension_numbers = #tpu.dot_dimension_numbers<[2], [1], [1], [2], [0, 0, 0, 1, 1, 2], [0], [0]>} : vector<2x8x16xbf16>, vector<2x16x128xbf16>, vector<2x8x128xf32> -> vector<2x8x128xf32>
    "tpu.trace_stop"() : () -> ()
    %18 = arith.addf %7, %15 : vector<2x16x128xf32>
    %19 = math.tanh %18 : vector<2x16x128xf32>
    %20 = arith.addf %8, %17 : vector<2x8x128xf32>
    %21 = math.tanh %20 : vector<2x8x128xf32>
    %c0_7 = arith.constant 0 : index
    %c0_8 = arith.constant 0 : index
    %22 = vector.load %arg2[%c0_7, %c0_8] : memref<2x128xf32, #tpu.memory_space<vmem>>, vector<2x128xf32>
    %23 = vector.extract_strided_slice %22 {offsets = [0, 0], sizes = [1, 128], strides = [1, 1]} : vector<2x128xf32> to vector<1x128xf32>
    %24 = vector.shape_cast %23 : vector<1x128xf32> to vector<1x1x128xf32>
    %25 = vector.broadcast %24 : vector<1x1x128xf32> to vector<2x16x128xf32>
    %26 = arith.mulf %19, %25 : vector<2x16x128xf32>
    %cst_9 = arith.constant dense<0.000000e+00> : vector<2x16xf32>
    %27 = vector.multi_reduction <add>, %26, %cst_9 [2] : vector<2x16x128xf32> to vector<2x16xf32>
    %28 = vector.shape_cast %27 : vector<2x16xf32> to vector<2x16x1xf32>
    %c0_10 = arith.constant 0 : index
    %29 = memref.load %arg3[%c0_10] : memref<2xf32, #tpu.memory_space<smem>>
    %30 = vector.broadcast %29 : f32 to vector<2x16x1xf32>
    %31 = arith.addf %28, %30 : vector<2x16x1xf32>
    %32 = vector.extract_strided_slice %22 {offsets = [1, 0], sizes = [1, 128], strides = [1, 1]} : vector<2x128xf32> to vector<1x128xf32>
    %33 = vector.shape_cast %32 : vector<1x128xf32> to vector<1x1x128xf32>
    %34 = vector.broadcast %33 : vector<1x1x128xf32> to vector<2x8x128xf32>
    %35 = arith.mulf %21, %34 : vector<2x8x128xf32>
    %cst_11 = arith.constant dense<0.000000e+00> : vector<2x8xf32>
    %36 = vector.multi_reduction <add>, %35, %cst_11 [2] : vector<2x8x128xf32> to vector<2x8xf32>
    %37 = vector.shape_cast %36 : vector<2x8xf32> to vector<2x8x1xf32>
    %c1 = arith.constant 1 : index
    %38 = memref.load %arg3[%c1] : memref<2xf32, #tpu.memory_space<smem>>
    %39 = vector.broadcast %38 : f32 to vector<2x8x1xf32>
    %40 = arith.addf %37, %39 : vector<2x8x1xf32>
    %cst_12 = arith.constant dense<0xFF800000> : vector<16x1xf32>
    %41 = vector.multi_reduction <maximumf>, %31, %cst_12 [0] : vector<2x16x1xf32> to vector<16x1xf32>
    %42 = vector.shape_cast %41 : vector<16x1xf32> to vector<1x16x1xf32>
    %43 = vector.broadcast %42 : vector<1x16x1xf32> to vector<2x16x1xf32>
    %44 = arith.subf %31, %43 : vector<2x16x1xf32>
    %45 = math.exp %44 : vector<2x16x1xf32>
    %cst_13 = arith.constant dense<0.000000e+00> : vector<16x1xf32>
    %46 = vector.multi_reduction <add>, %45, %cst_13 [0] : vector<2x16x1xf32> to vector<16x1xf32>
    %47 = vector.shape_cast %46 : vector<16x1xf32> to vector<1x16x1xf32>
    %48 = vector.broadcast %47 : vector<1x16x1xf32> to vector<2x16x1xf32>
    %49 = arith.divf %45, %48 : vector<2x16x1xf32>
    %cst_14 = arith.constant dense<0xFF800000> : vector<8x1xf32>
    %50 = vector.multi_reduction <maximumf>, %40, %cst_14 [0] : vector<2x8x1xf32> to vector<8x1xf32>
    %51 = vector.shape_cast %50 : vector<8x1xf32> to vector<1x8x1xf32>
    %52 = vector.broadcast %51 : vector<1x8x1xf32> to vector<2x8x1xf32>
    %53 = arith.subf %40, %52 : vector<2x8x1xf32>
    %54 = math.exp %53 : vector<2x8x1xf32>
    %cst_15 = arith.constant dense<0.000000e+00> : vector<8x1xf32>
    %55 = vector.multi_reduction <add>, %54, %cst_15 [0] : vector<2x8x1xf32> to vector<8x1xf32>
    %56 = vector.shape_cast %55 : vector<8x1xf32> to vector<1x8x1xf32>
    %57 = vector.broadcast %56 : vector<1x8x1xf32> to vector<2x8x1xf32>
    %58 = arith.divf %54, %57 : vector<2x8x1xf32>
    %59 = vector.extract_strided_slice %0 {offsets = [0, 0, 0], sizes = [2, 16, 128], strides = [1, 1, 1]} : vector<2x24x128xf32> to vector<2x16x128xf32>
    %60 = vector.broadcast %49 : vector<2x16x1xf32> to vector<2x16x128xf32>
    %61 = arith.mulf %60, %59 : vector<2x16x128xf32>
    %cst_16 = arith.constant dense<0.000000e+00> : vector<2x128xf32>
    %62 = vector.multi_reduction <add>, %61, %cst_16 [1] : vector<2x16x128xf32> to vector<2x128xf32>
    %63 = vector.shape_cast %62 : vector<2x128xf32> to vector<2x1x128xf32>
    %c0_17 = arith.constant 0 : index
    %c0_18 = arith.constant 0 : index
    %c0_19 = arith.constant 0 : index
    %64 = vector.load %arg4[%c0_17, %c0_18, %c0_19] : memref<2x2x128xf32, #tpu.memory_space<vmem>>, vector<2x1x128xf32>
    tpu.vector_store %arg4[%c0_17, %c0_18, %c0_19], %63 {strides = array<i32>} : memref<2x2x128xf32, #tpu.memory_space<vmem>>, vector<2x1x128xf32>,
    %65 = vector.extract_strided_slice %0 {offsets = [0, 16, 0], sizes = [2, 8, 128], strides = [1, 1, 1]} : vector<2x24x128xf32> to vector<2x8x128xf32>
    %66 = vector.broadcast %58 : vector<2x8x1xf32> to vector<2x8x128xf32>
    %67 = arith.mulf %66, %65 : vector<2x8x128xf32>
    %cst_20 = arith.constant dense<0.000000e+00> : vector<2x128xf32>
    %68 = vector.multi_reduction <add>, %67, %cst_20 [1] : vector<2x8x128xf32> to vector<2x128xf32>
    %69 = vector.shape_cast %68 : vector<2x128xf32> to vector<2x1x128xf32>
    %c0_21 = arith.constant 0 : index
    %c1_22 = arith.constant 1 : index
    %c0_23 = arith.constant 0 : index
    %70 = vector.load %arg4[%c0_21, %c1_22, %c0_23] : memref<2x2x128xf32, #tpu.memory_space<vmem>>, vector<2x1x128xf32>
    tpu.vector_store %arg4[%c0_21, %c1_22, %c0_23], %69 {strides = array<i32>} : memref<2x2x128xf32, #tpu.memory_space<vmem>>, vector<2x1x128xf32>,
    return
  }
}

</mosaic_0001>

<bundles_post_ra>
// kernel: coattention.1
= control target key start
LH: loop header
LB: loop body
LE: loop exit
PB: predicated region body
PF: predicated region fallthrough
CT: control target
= control target key end

     0   :  { %9 = vsyncpa [#allocation3], 0  ;;  %s1154_s0 = inlined_call_operand.vmem [shape: f32[2,24,128], index: 0, kind: input, shape index: {}]   ;;  %s1155_s1 = inlined_call_operand.hbm [shape: bf16[128,384], index: 1, kind: input, shape index: {}]   ;;  %s1156_s2 = inlined_call_operand.vmem [shape: f32[2,128], index: 2, kind: input, shape index: {}]   ;;  %s1157_s3 = inlined_call_operand.vmem [shape: f32[2], index: 3, kind: input, shape index: {}]   ;;  %s1158_s4 = inlined_call_operand.vmem [shape: f32[2,2,128], index: 4, kind: output, shape index: {}]  }
   0x1   :  { %10 = vsyncpa [#allocation4], 0  ;;  %s999_s15 = smov [#allocation2]   ;;  %s33_s19 = sshll.u32 %s1157_s3, 4  ;;  %s34_s19 = int_to_ptr.vmem [resolvable:$true] %s33_s19 }
   0x2   :  { %s18_s16 = sshll.u32 %s999_s15, 4  ;;  %s19_s16 = int_to_ptr.vmem [resolvable:$true] %s18_s16 }
   0x3   :  { %s971_s20 = scalar_lea.vmem %s19_s16, 3072  ;;  %p976_p1 = scmp.lt.s32.totalorder %s19_s16, %s19_s16 }
   0x4   :  { %p972_p0 = scmp.ne.s32.totalorder %s19_s16, %s971_s20  ;;  %p977_p2 = scmp.lt.s32.totalorder %s971_s20, %s971_s20 }
   0x6   :  { %p978_p3 = por %p977_p2, %p976_p1 }
   0x8   :  { %p979_p4 = pnand %p978_p3, %p972_p0 }
   0xa   :  { %982 = shalt.err (!%p979_p4)
}
   0xb   :  { %s1000_s21 = smov 192   ;;  %s1001_s22 = smov 12  }
   0xc   :  { %24 = dma.hbm_to_vmem [thread:$0]  %s1155_s1, 3072, %s19_s16, [#allocation3], %s1000_s21, %s1000_s21, %s1001_s22  }
   0xd   :  { %s983_s25 = scalar_lea.vmem %s34_s19, 16  ;;  %p988_p6 = scmp.lt.s32.totalorder %s34_s19, %s34_s19 }
   0xe   :  { %p984_p5 = scmp.ne.s32.totalorder %s34_s19, %s983_s25  ;;  %p989_p7 = scmp.lt.s32.totalorder %s983_s25, %s983_s25 }
  0x10   :  { %p990_p8 = por %p989_p7, %p988_p6 }
  0x12   :  { %p991_p9 = pnand %p990_p8, %p984_p5 }
  0x14   :  { %994 = shalt.err (!%p991_p9)
}
  0x15   :  { %s1002_s3 = smov [#allocation5]  }
  0x16   :  { %36 = dma.vmem_to_smem %s34_s19, 16, %s1002_s3, [#allocation4]  }
  0x17   :  { %995 = dma.done.wait [#allocation3], 3072  }
  0x18   :  { %996 = vsyncadd [#allocation3], 4294964224 }
  0x19   :  { %997 = dma.done.wait [#allocation4], 16  }
  0x1a   :  { %998 = vsyncadd [#allocation4], 4294967280 }
  0x1b   :  { %43 = sfence }
  0x1c   :  { %v897_v0 = vld [vmem:[#allocation2 + $0xac] ss:$12 sps:$4 sm:$0xff]   ;;  %v899_v1 = vld [vmem:[#allocation2 + $0xa8] ss:$12 sps:$4 sm:$0xff]   ;;  %v1003_v2 = vmov 0   ;;  %v1004_v3 = vmov 0.0  }
  0x1d   :  { %263 = vmatprep.mubr.bf16.mxu0 %v1003_v2  ;;  %826 = vmatprep.subr.bf16.mxu1 %v1004_v3  ;;  %v900_v4 = vld [vmem:[#allocation2 + $0x94] ss:$12 sps:$4 sm:$0xff]   ;;  %v902_v5 = vld [vmem:[#allocation2 + $0x90] ss:$12 sps:$4 sm:$0xff]   ;;  %v905_v7 = vld [vmem:[#allocation2 + $0x78] ss:$12 sps:$4 sm:$0xff]  }
  0x1e   :  { %231 = vmatprep.subr.bf16.mxu0 %v897_v0  ;;  %v903_v6 = vld [vmem:[#allocation2 + $0x7c] ss:$12 sps:$4 sm:$0xff]   ;;  %v906_v8 = vld [vmem:[#allocation2 + $0x64] ss:$12 sps:$4 sm:$0xff]   ;;  %v908_v9 = vld [vmem:[#allocation2 + $0x60] ss:$12 sps:$4 sm:$0xff]  }
  0x1f   :  { %232 = vmatpush1.bf16.msra.mxu0 %v899_v1  ;;  %v909_v10 = vld [vmem:[#allocation2 + $0x4c] ss:$12 sps:$4 sm:$0xff]   ;;  %v921_v11 = vld [vmem:[#allocation2 + $0xb0] ss:$12 sps:$4 sm:$0xff]   ;;  %v911_v12 = vld [vmem:[#allocation2 + $0x48] ss:$12 sps:$4 sm:$0xff]  }
  0x20   :  { %233 = vmatprep.subr.bf16.mxu0 %v900_v4  ;;  %827 = vmatpush3.bf16.msra.mxu1 %v921_v11  ;;  %v922_v13 = vld [vmem:[#allocation2 + $0x98] ss:$12 sps:$4 sm:$0xff]   ;;  %v912_v14 = vld [vmem:[#allocation2 + $0x34] ss:$12 sps:$4 sm:$0xff]   ;;  %v914_v15 = vld [vmem:[#allocation2 + $0x30] ss:$12 sps:$4 sm:$0xff]  }
  0x21   :  { %828 = vmatprep.subr.bf16.mxu1 %v1004_v3  ;;  %v923_v16 = vld [vmem:[#allocation2 + $0x80] ss:$12 sps:$4 sm:$0xff]   ;;  %v915_v17 = vld [vmem:[#allocation2 + $0x1c] ss:$12 sps:$4 sm:$0xff]   ;;  %v917_v18 = vld [vmem:[#allocation2 + $0x18] ss:$12 sps:$4 sm:$0xff]  }
  0x22   :  { %v924_v19 = vld [vmem:[#allocation2 + $0x68] ss:$12 sps:$4 sm:$0xff]   ;;  %v918_v20 = vld [vmem:[#allocation2 + $0x4] ss:$12 sps:$4 sm:$0xff]   ;;  %v920_v21 = vld [vmem:[#allocation2] ss:$12 sps:$4 sm:$0xff]  }
  0x23   :  { %234 = vmatpush1.bf16.msra.mxu0 %v902_v5  ;;  %v1045_v22 = vld [vmem:[%s1154_s0] sm:$0xff]  ;;  %v1050_v23 = vld [vmem:[%s1154_s0 + $0x8] sm:$0xff]  ;;  %v925_v24 = vld [vmem:[#allocation2 + $0x50] ss:$12 sps:$4 sm:$0xff]   ;;  %vm1005_vm0 = vmmov 0   ;;  %vm451_vm1 = vcmask 1043456  }
  0x24   :  { %235 = vmatprep.subr.bf16.mxu0 %v903_v6  ;;  %829 = vmatpush3.bf16.msra.mxu1 %v922_v13  ;;  %v51_v25 = vpack.c.bf16 %v1050_v23, %v1045_v22  ;;  %v926_v26 = vld [vmem:[#allocation2 + $0x38] ss:$12 sps:$4 sm:$0xff]   ;;  %v1060_v27 = vld [vmem:[%s1154_s0 + $0x10] sm:$0xff]  ;;  %v1076_v30 = vld [vmem:[%s1154_s0 + $0x28] sm:$0xff]  ;;  %vm447_vm2 = vcmask 64512   ;;  %vm561_vm3 = vcmask 130048  }
  0x25   :  { %830 = vmatprep.subr.bf16.mxu1 %v1004_v3  ;;  %v1065_v28 = vld [vmem:[%s1154_s0 + $0x18] sm:$0xff]  ;;  %v1071_v29 = vld [vmem:[%s1154_s0 + $0x20] sm:$0xff]  ;;  %v54_v34 = vpack.c.bf16 %v1076_v30, %v1076_v30  ;;  %v928_v35 = vld [vmem:[#allocation2 + $0x8] ss:$12 sps:$4 sm:$0xff]   ;;  %842 = vmatprep.mubr.msk.bf16.mxu1 %vm1005_vm0, %v1004_v3  ;;  %v52_v45 = vpack.c.bf16 %v1060_v27, %v1060_v27  ;;  %s801_s12 = sld [smem:[#allocation5 + $0x1]] }
  0x26   :  { %v927_v31 = vld [vmem:[#allocation2 + $0x20] ss:$12 sps:$4 sm:$0xff]   ;;  %v802_v32 = vpack.c.bf16 %v1065_v28, %v1060_v27  ;;  %v53_v33 = vpack.c.bf16 %v1071_v29, %v1065_v28 }
  0x27   :  { %236 = vmatpush1.bf16.msra.mxu0 %v905_v7  ;;  %v64_v37 = vunpack.c.l.b16 %v54_v34 }
  0x28   :  { %237 = vmatprep.subr.bf16.mxu0 %v906_v8  ;;  %831 = vmatpush3.bf16.msra.mxu1 %v923_v16  ;;  %v63_v36 = vunpack.c.h.b16 %v53_v33 }
  0x29   :  { %832 = vmatprep.subr.bf16.mxu1 %v1004_v3 }
  0x2a   :  { %v99_v38 = vpack.c.b16 %v64_v37, %v63_v36 }
  0x2b   :  { %238 = vmatpush1.bf16.msra.mxu0 %v908_v9 }
  0x2c   :  { %239 = vmatprep.subr.bf16.mxu0 %v909_v10  ;;  %833 = vmatpush3.bf16.msra.mxu1 %v924_v19 }
  0x2d   :  { %834 = vmatprep.subr.bf16.mxu1 %v1004_v3 }
  0x2f   :  { %240 = vmatpush1.bf16.msra.mxu0 %v911_v12 }
  0x30   :  { %241 = vmatprep.subr.bf16.mxu0 %v912_v14  ;;  %835 = vmatpush3.bf16.msra.mxu1 %v925_v24 }
  0x31   :  { %836 = vmatprep.subr.bf16.mxu1 %v1004_v3 }
  0x33   :  { %242 = vmatpush1.bf16.msra.mxu0 %v914_v15 }
  0x34   :  { %243 = vmatprep.subr.bf16.mxu0 %v915_v17  ;;  %837 = vmatpush3.bf16.msra.mxu1 %v926_v26 }
  0x35   :  { %838 = vmatprep.subr.bf16.mxu1 %v1004_v3 }
  0x37   :  { %244 = vmatpush1.bf16.msra.mxu0 %v917_v18 }
  0x38   :  { %245 = vmatprep.subr.bf16.mxu0 %v918_v20  ;;  %839 = vmatpush3.bf16.msra.mxu1 %v927_v31  ;;  %v661_v31 = vlaneseq }
  0x39   :  { %840 = vmatprep.subr.bf16.mxu1 %v1004_v3 }
  0x3b   :  { %246 = vmatpush1.bf16.msra.mxu0 %v920_v21 }
  0x3c   :  { %854 = vmatprep.subr.bf16.mxu0 %v1004_v3  ;;  %841 = vmatpush3.bf16.msra.mxu1 %v928_v35  ;;  %v662_v35 = vshrl.u32 %v661_v31, 7 }
  0x3d   :  { %860 = vmatprep.subr.bf16.mxu1 %v1004_v3 }
  0x3e   :  { %264 = vmatmul.mubr.bf16.vlgmr.msra.gmra.mxu0 %v51_v25 }
  0x3f   :  { %273 = vmatprep.mubr.bf16.mxu0 %v1003_v2  ;;  %843 = vmatmul.mubr.bf16.vlgmr.msra.gmra.mxu1 %v51_v25 }
  0x40   :  { %846 = vmatprep.mubr.msk.bf16.mxu1 %vm1005_vm0, %v1004_v3 }
  0x46   :  { %274 = vmatmul.mubr.bf16.gmra.mxu0 %v802_v32 }
  0x47   :  { %281 = vmatprep.mubr.bf16.mxu0 %v1003_v2  ;;  %847 = vmatmul.mubr.bf16.gmra.mxu1 %v802_v32 }
  0x48   :  { %850 = vmatprep.mubr.msk.bf16.mxu1 %vm1005_vm0, %v1004_v3 }
  0x4e   :  { %282 = vmatmul.mubr.bf16.gmra.mxu0 %v99_v38 }
  0x4f   :  { %856 = vmatprep.mubr.msk.bf16.mxu0 %vm1005_vm0, %v1004_v3  ;;  %851 = vmatmul.mubr.bf16.gmra.mxu1 %v99_v38 }
  0x50   :  { %862 = vmatprep.mubr.msk.bf16.mxu1 %vm1005_vm0, %v1004_v3 }
  0xfe   :  { %v265_v39 = vpop.f32.mrf.mxu0 }
  0xff   :  { %v324_v54 = vpop.f32.mrf.mxu1 }
 0x100   :  { %v1098_v40 = vpop.f32.mrf.mxu0 }
 0x101   :  { %v844_v55 = vpop.f32.mrf.mxu1 }
 0x102   :  { %v269_v41 = vpop.f32.mrf.mxu0 }
 0x103   :  { %v343_v42 = vpack.c.bf16 %v269_v41, %v265_v39  ;;  %v326_v56 = vpop.f32.mrf.mxu1  ;;  %v663_v39 = vsub.s32 0, %v662_v35 }
 0x104   :  { %v1100_v43 = vpop.f32.mrf.mxu0 }
 0x105   :  { %855 = vmatpush3.bf16.xpose.msra.mxu0 %v343_v42  ;;  %v845_v57 = vpop.f32.mrf.mxu1  ;;  %v559_v19 = vpack.c.bf16 %v1100_v43, %v1098_v40 }
 0x106   :  { %v275_v44 = vpop.f32.mrf.mxu0  ;;  %866 = vmatprep.subr.bf16.mxu0 %v1004_v3 }
 0x107   :  { %v330_v58 = vpop.f32.mrf.mxu1 }
 0x108   :  { %v276_v46 = vpop.f32.mrf.mxu0  ;;  %v429_v61 = vpack.c.bf16 %v330_v58, %v330_v58 }
 0x109   :  { %v848_v59 = vpop.f32.mrf.mxu1 }
 0x10a   :  { %v277_v47 = vpop.f32.mrf.mxu0  ;;  %v453_v0 = vsel %vm451_vm1, %v429_v61, 0 }
 0x10b   :  { %v333_v60 = vpop.f32.mrf.mxu1 }
 0x10c   :  { %v1105_v48 = vpop.f32.mrf.mxu0  ;;  %857 = vmatmul.mubr.bf16.vlgmr.msra.gmra.mxu0 %v52_v45 }
 0x10d   :  { %868 = vmatprep.mubr.msk.bf16.mxu0 %vm1005_vm0, %v1004_v3  ;;  %v849_v62 = vpop.f32.mrf.mxu1  ;;  %867 = vmatpush3.bf16.msra.mxu0 %v453_v0 }
 0x10e   :  { %v283_v49 = vpop.f32.mrf.mxu0  ;;  %878 = vmatprep.subr.bf16.mxu0 %v1004_v3 }
 0x10f   :  { %v344_v50 = vpack.c.bf16 %v283_v49, %v277_v47  ;;  %v337_v63 = vpop.f32.mrf.mxu1 }
 0x110   :  { %v1109_v51 = vpop.f32.mrf.mxu0 }
 0x111   :  { %861 = vmatpush3.bf16.xpose.msra.mxu1 %v344_v50  ;;  %v852_v1 = vpop.f32.mrf.mxu1  ;;  %v560_v21 = vpack.c.bf16 %v1109_v51, %v1105_v48 }
 0x112   :  { %v287_v52 = vpop.f32.mrf.mxu0  ;;  %872 = vmatprep.subr.bf16.mxu1 %v1004_v3 }
 0x113   :  { %v1115_v2 = vpop.f32.mrf.mxu1 }
 0x114   :  { %v288_v53 = vpop.f32.mrf.mxu0  ;;  %v430_v4 = vpack.c.bf16 %v1115_v2, %v1115_v2 }
 0x115   :  { %v853_v5 = vpop.f32.mrf.mxu1  ;;  %v685_v53 = vsub.s32 1, %v662_v35 }
 0x116   :  { %v516_v6 = vsel %vm451_vm1, %v430_v4, 0 }
 0x118   :  { %863 = vmatmul.mubr.bf16.vlgmr.msra.gmra.mxu1 %v54_v34 }
 0x119   :  { %874 = vmatprep.mubr.msk.bf16.mxu1 %vm1005_vm0, %v1004_v3  ;;  %873 = vmatpush3.bf16.msra.mxu1 %v516_v6 }
 0x11a   :  { %884 = vmatprep.subr.bf16.mxu1 %v1004_v3 }
 0x1cc   :  { %v379_v7 = vpop.f32.mrf.mxu0 }
 0x1cd   :  { %929 = vtanh.f32 %v379_v7 }
 0x1ce   :  { %v858_v8 = vpop.f32.mrf.mxu0 }
 0x1d0   :  { %v382_v9 = vpop.f32.mrf.mxu0 }
 0x1d2   :  { %v859_v10 = vpop.f32.mrf.mxu0 }
 0x1d8   :  { %v419_v11 = vpop.f32.mrf.mxu1 }
 0x1d9   :  { %931 = vtanh.f32 %v419_v11 }
 0x1da   :  { %v930_v12 = vpop.eup %929  ;;  %v864_v13 = vpop.f32.mrf.mxu1 }
 0x1db   :  { %v427_v14 = vpack.c.bf16 %v930_v12, %v930_v12 }
 0x1dc   :  { %v422_v15 = vpop.f32.mrf.mxu1 }
 0x1dd   :  { %431 = vxpose.xlu0.c.b16.start.end [1/1] (short) (narrow) %v427_v14, 16 }
 0x1de   :  { %v865_v16 = vpop.f32.mrf.mxu1 }
 0x1e6   :  { %v932_v17 = vpop.eup %931 }
 0x1e7   :  { %v428_v18 = vpack.c.bf16 %v932_v17, %v932_v17 }
 0x1e9   :  { %496 = vxpose.xlu0.c.b16.start.end [1/1] (short) (narrow) %v428_v18, 16 }
 0x23f   :  { %v439_v20 = vpop.trf.xlu0 }
 0x240   :  { %869 = vmatmul.mubr.msk.bf16.vlgmr.msra.gmra.mxu0 %vm447_vm2, %v439_v20 }
 0x241   :  { %879 = vmatpush3.bf16.msra.mxu0 %v559_v19  ;;  %880 = vmatprep.mubr.msk.bf16.mxu0 %vm1005_vm0, %v1004_v3 }
 0x248   :  { %881 = vmatmul.mubr.msk.bf16.vlgmr.msra.gmra.mxu0 %vm561_vm3, %v427_v14  ;;  %v694_v14 = vstv %s801_s12 }
 0x24b   :  { %v504_v24 = vpop.trf.xlu0 }
 0x24c   :  { %875 = vmatmul.mubr.msk.bf16.vlgmr.msra.gmra.mxu1 %vm447_vm2, %v504_v24 }
 0x24d   :  { %885 = vmatpush3.bf16.msra.mxu1 %v560_v21  ;;  %886 = vmatprep.mubr.msk.bf16.mxu1 %vm1005_vm0, %v1004_v3  ;;  %v660_v3 = vld [vmem:[%s1156_s2] sm:$0x3]  ;;  %s677_s2 = sld [smem:[#allocation5]] }
 0x24e   :  { %v664_v45 = vrot.slane %v660_v3, %v663_v39  ;;  %v686_v59 = vrot.slane %v660_v3, %v685_v53 }
 0x253   :  { %v678_v8 = vstv %s677_s2 }
 0x254   :  { %887 = vmatmul.mubr.msk.bf16.vlgmr.msra.gmra.mxu1 %vm561_vm3, %v428_v18 }
 0x300   :  { %v489_v25 = vpop.f32.mrf.mxu0 }
 0x301   :  { %v648_v26 = vadd.f32 %v489_v25, %v1098_v40 }
 0x302   :  { %v870_v32 = vpop.f32.mrf.mxu0 }
 0x303   :  { %933 = vtanh.f32 %v648_v26 }
 0x304   :  { %v492_v33 = vpop.f32.mrf.mxu0 }
 0x305   :  { %v649_v34 = vadd.f32 %v492_v33, %v1100_v43 }
 0x306   :  { %v871_v36 = vpop.f32.mrf.mxu0 }
 0x307   :  { %935 = vtanh.f32 %v649_v34 }
 0x308   :  { %v599_v37 = vpop.f32.mrf.mxu0 }
 0x309   :  { %v656_v38 = vadd.f32 %v599_v37, %v330_v58 }
 0x30a   :  { %v882_v41 = vpop.f32.mrf.mxu0 }
 0x30b   :  { %937 = vtanh.f32 %v656_v38 }
 0x30c   :  { %v552_v42 = vpop.f32.mrf.mxu1  ;;  %v602_v40 = vpop.f32.mrf.mxu0 }
 0x30d   :  { %v650_v44 = vadd.f32 %v552_v42, %v1105_v48 }
 0x30e   :  { %v876_v46 = vpop.f32.mrf.mxu1  ;;  %v883_v47 = vpop.f32.mrf.mxu0 }
 0x30f   :  { %939 = vtanh.f32 %v650_v44 }
 0x310   :  { %v934_v43 = vpop.eup %933  ;;  %v555_v49 = vpop.f32.mrf.mxu1 }
 0x311   :  { %v651_v50 = vadd.f32 %v555_v49, %v1109_v51  ;;  %v665_v52 = vmul.f32 %v934_v43, %v664_v45 }
 0x312   :  { %v877_v54 = vpop.f32.mrf.mxu1 }
 0x313   :  { %941 = vtanh.f32 %v651_v50  ;;  %669 = vadd.xlane.f32.xlu1 %v665_v52 }
 0x314   :  { %v936_v55 = vpop.eup %935  ;;  %v642_v56 = vpop.f32.mrf.mxu1 }
 0x315   :  { %v657_v57 = vadd.f32 %v642_v56, %v1115_v2  ;;  %v666_v58 = vmul.f32 %v936_v55, %v664_v45 }
 0x316   :  { %v888_v48 = vpop.f32.mrf.mxu1 }
 0x317   :  { %943 = vtanh.f32 %v657_v57  ;;  %671 = vadd.xlane.f32.xlu1 %v666_v58 }
 0x318   :  { %v938_v60 = vpop.eup %937  ;;  %v645_v61 = vpop.f32.mrf.mxu1 }
 0x319   :  { %v687_v62 = vmul.f32 %v938_v60, %v686_v59 }
 0x31a   :  { %v889_v63 = vpop.f32.mrf.mxu1 }
 0x31b   :  { %689 = vadd.xlane.f32.xlu1 %v687_v62 }
 0x31c   :  { %v940_v51 = vpop.eup %939 }
 0x31d   :  { %v667_v0 = vmul.f32 %v940_v51, %v664_v45 }
 0x31f   :  { %673 = vadd.xlane.f32.xlu0 %v667_v0 }
 0x320   :  { %v942_v1 = vpop.eup %941 }
 0x321   :  { %v668_v4 = vmul.f32 %v942_v1, %v664_v45 }
 0x323   :  { %675 = vadd.xlane.f32.xlu1 %v668_v4 }
 0x324   :  { %v944_v5 = vpop.eup %943 }
 0x325   :  { %v688_v6 = vmul.f32 %v944_v5, %v686_v59 }
 0x327   :  { %691 = vadd.xlane.f32.xlu1 %v688_v6 }
 0x39c   :  { %v670_v2 = vpop.xlane.xlu1 %669 }
 0x39d   :  { %v679_v11 = vadd.f32 %v678_v8, %v670_v2 }
 0x3a0   :  { %v672_v7 = vpop.xlane.xlu1 %671 }
 0x3a1   :  { %v680_v16 = vadd.f32 %v678_v8, %v672_v7 }
 0x3a4   :  { %v690_v9 = vpop.xlane.xlu1 %689 }
 0x3a5   :  { %v695_v25 = vadd.f32 %v694_v14, %v690_v9 }
 0x3a8   :  { %v674_v10 = vpop.xlane.xlu0 %673 }
 0x3a9   :  { %v681_v12 = vadd.f32 %v678_v8, %v674_v10 }
 0x3ab   :  { %v697_v13 = vmax.f32 %v679_v11, %v681_v12 }
 0x3ac   :  { %v676_v15 = vpop.xlane.xlu1 %675 }
 0x3ad   :  { %v699_v17 = vsub.f32 %v679_v11, %v697_v13  ;;  %v701_v18 = vsub.f32 %v681_v12, %v697_v13  ;;  %v682_v19 = vadd.f32 %v678_v8, %v676_v15 }
 0x3af   :  { %v703_v20 = vmul.f32 1.442695, %v699_v17  ;;  %v707_v21 = vmul.f32 1.442695, %v701_v18  ;;  %v698_v24 = vmax.f32 %v680_v16, %v682_v19 }
 0x3b0   :  { %v692_v26 = vpop.xlane.xlu1 %691 }
 0x3b1   :  { %945 = vpow2.f32 %v703_v20  ;;  %v700_v31 = vsub.f32 %v680_v16, %v698_v24  ;;  %v702_v32 = vsub.f32 %v682_v19, %v698_v24  ;;  %v696_v33 = vadd.f32 %v694_v14, %v692_v26 }
 0x3b2   :  { %947 = vpow2.f32 %v707_v21 }
 0x3b3   :  { %v705_v34 = vmul.f32 1.442695, %v700_v31  ;;  %v709_v35 = vmul.f32 1.442695, %v702_v32  ;;  %v719_v36 = vmax.f32 %v695_v25, %v696_v33 }
 0x3b5   :  { %949 = vpow2.f32 %v705_v34  ;;  %v720_v37 = vsub.f32 %v695_v25, %v719_v36  ;;  %v721_v38 = vsub.f32 %v696_v33, %v719_v36 }
 0x3b6   :  { %951 = vpow2.f32 %v709_v35 }
 0x3b7   :  { %v722_v39 = vmul.f32 1.442695, %v720_v37  ;;  %v724_v41 = vmul.f32 1.442695, %v721_v38 }
 0x3b9   :  { %953 = vpow2.f32 %v722_v39 }
 0x3ba   :  { %955 = vpow2.f32 %v724_v41 }
 0x3be   :  { %v946_v3 = vpop.eup %945 }
 0x3bf   :  { %v948_v42 = vpop.eup %947 }
 0x3c0   :  { %v711_v40 = vadd.f32 %v948_v42, %v946_v3 }
 0x3c2   :  { %v950_v44 = vpop.eup %949  ;;  %957 = vrcp.f32 %v711_v40 }
 0x3c3   :  { %v952_v45 = vpop.eup %951 }
 0x3c4   :  { %v712_v46 = vadd.f32 %v952_v45, %v950_v44 }
 0x3c6   :  { %v954_v47 = vpop.eup %953  ;;  %959 = vrcp.f32 %v712_v46 }
 0x3c7   :  { %v956_v43 = vpop.eup %955 }
 0x3c8   :  { %v726_v49 = vadd.f32 %v956_v43, %v954_v47 }
 0x3ca   :  { %961 = vrcp.f32 %v726_v49 }
 0x3cf   :  { %v958_v50 = vpop.eup %957 }
 0x3d0   :  { %v714_v52 = vmul.f32 %v958_v50, %v946_v3  ;;  %v717_v53 = vmul.f32 %v958_v50, %v948_v42 }
 0x3d2   :  { %v730_v57 = vmul.f32 %v714_v52, %v1045_v22  ;;  %v732_v58 = vmul.f32 %v717_v53, %v1065_v28 }
 0x3d3   :  { %v960_v54 = vpop.eup %959 }
 0x3d4   :  { %v716_v55 = vmul.f32 %v960_v54, %v950_v44  ;;  %v718_v56 = vmul.f32 %v960_v54, %v952_v45 }
 0x3d6   :  { %v731_v59 = vmul.f32 %v716_v55, %v1050_v23  ;;  %v733_v48 = vmul.f32 %v718_v56, %v1071_v29 }
 0x3d7   :  { %v962_v60 = vpop.eup %961 }
 0x3d8   :  { %v734_v61 = vadd.f32 %v731_v59, %v730_v57  ;;  %v741_v62 = vadd.f32 %v733_v48, %v732_v58  ;;  %v728_v63 = vmul.f32 %v962_v60, %v954_v47  ;;  %v729_v51 = vmul.f32 %v962_v60, %v956_v43 }
 0x3da   :  { %v735_v0 = vrot.slane %v734_v61, 4  ;;  %v742_v1 = vrot.slane %v741_v62, 4  ;;  %v750_v4 = vmul.f32 %v728_v63, %v1060_v27  ;;  %v751_v5 = vmul.f32 %v729_v51, %v1076_v30 }
 0x3dc   :  { %v736_v6 = vadd.f32 %v735_v0, %v734_v61  ;;  %v743_v2 = vadd.f32 %v742_v1, %v741_v62  ;;  %v752_v22 = vrot.slane %v750_v4, 4  ;;  %v758_v7 = vrot.slane %v751_v5, 4 }
 0x3de   :  { %v737_v28 = vrot.slane %v736_v6, 2  ;;  %v744_v8 = vrot.slane %v743_v2, 2  ;;  %v753_v23 = vadd.f32 %v752_v22, %v750_v4  ;;  %v759_v9 = vadd.f32 %v758_v7, %v751_v5 }
 0x3e0   :  { %v738_v29 = vadd.f32 %v737_v28, %v736_v6  ;;  %v745_v10 = vadd.f32 %v744_v8, %v743_v2  ;;  %v754_v11 = vrot.slane %v753_v23, 2  ;;  %v760_v12 = vrot.slane %v759_v9, 2 }
 0x3e2   :  { %v739_v13 = vrot.slane %v738_v29, 1  ;;  %v746_v14 = vrot.slane %v745_v10, 1  ;;  %v755_v15 = vadd.f32 %v754_v11, %v753_v23  ;;  %v761_v16 = vadd.f32 %v760_v12, %v759_v9 }
 0x3e4   :  { %v740_v17 = vadd.f32 %v739_v13, %v738_v29  ;;  %v747_v27 = vadd.f32 %v746_v14, %v745_v10  ;;  %v756_v18 = vrot.slane %v755_v15, 1  ;;  %v762_v30 = vrot.slane %v761_v16, 1 }
 0x3e6   :  { %748 = vst [vmem:[%s1158_s4] sm:$0x1] %v740_v17  ;;  %749 = vst [vmem:[%s1158_s4 + $0x2] sm:$0x1] %v747_v27  ;;  %v757_v19 = vadd.f32 %v756_v18, %v755_v15  ;;  %v763_v20 = vadd.f32 %v762_v30, %v761_v16 }
 0x3e8   :  { %764 = vst [vmem:[%s1158_s4 + $0x1] sm:$0x1] %v757_v19  ;;  %765 = vst [vmem:[%s1158_s4 + $0x3] sm:$0x1] %v763_v20 }
 0x3e9   :  { %770 = vsyncpa [#allocation3], 1 }
 0x3ea   :  { %771 = vsyncpa [#allocation4], 1 }

</bundles_post_ra>
